<compile_context>
chip_gen: v7x
topology: tpu7x:2x2x1
jax: 0.10.0
libtpu: 0.0.40
codegen_flags: <defaults>
</compile_context>

<pallas_src>
import functools

import jax
import jax.numpy as jnp
from jax.experimental import pallas as pl
from jax.experimental.pallas import tpu as pltpu


def _round_up(x, m):
    return (x + m - 1) // m * m


# ---------------------------------------------------------------------------
# Layout plumbing (wrapper side only, pure reshape/transpose -> fusable by XLA)
# ---------------------------------------------------------------------------
def _space_to_depth_channel_major(x_nchw, levels):
    """NCHW -> (C, N*H*W) channel-major matrix whose columns are in recursive
    parity-grouped (space-to-depth) order:

        col(n, h, w) = q * (N*H*W/4) + col_next(n, h//2, w//2),  q = 2*(h%2)+(w%2)
        base (levels == 0):  col(n, h, w) = (h*W + w)*N + n

    With this ordering every stride-2 2x2 conv reads 4 *contiguous* lane slices
    of its input and writes output already ordered for the next stage, and the
    final 4x4 conv reads 16 contiguous (C, N) lane slices.  No gather is used.
    """
    g = jnp.transpose(x_nchw, (1, 0, 2, 3))[:, None]           # (C, 1, N, H, W)
    for _ in range(levels):
        Cc, G, Nn, Hh, Ww = g.shape
        g = g.reshape(Cc, G, Nn, Hh // 2, 2, Ww // 2, 2)
        g = jnp.transpose(g, (0, 1, 4, 6, 2, 3, 5))            # (C, G, hp, wp, N, H/2, W/2)
        g = g.reshape(Cc, G * 4, Nn, Hh // 2, Ww // 2)
    Cc, G, Nn, Hh, Ww = g.shape
    g = jnp.transpose(g, (0, 1, 3, 4, 2))                      # base order (h*W + w)*N + n
    return g.reshape(Cc, G * Hh * Ww * Nn)


def pack_params(params, hg_feat, cp):
    """One-time parameter packing (call at init time, NOT per forward).

    Returns:
      w_pack: (depth, cp, 16*cp) f32 -- stage j's tap (kh,kw) at lanes
              [tap*cp + cin]; taps beyond the stage's kernel size are zero.
      b_pack: (cp, depth) f32
    """
    w_slices, b_cols = [], []
    for (w, b) in params:                                       # w: (C, C, kh, kw)
        kh, kw = int(w.shape[2]), int(w.shape[3])
        n_tap = kh * kw
        assert n_tap <= 16
        wq = jnp.transpose(w, (2, 3, 0, 1)).reshape(n_tap, hg_feat, hg_feat)  # [tap,o,cin]
        wq = jnp.pad(wq, ((0, 16 - n_tap), (0, cp - hg_feat), (0, cp - hg_feat)))
        w_slices.append(jnp.transpose(wq, (1, 0, 2)).reshape(cp, 16 * cp))    # [o, tap*cp+cin]
        b_cols.append(jnp.pad(b, (0, cp - hg_feat)))
    return jnp.stack(w_slices, axis=0), jnp.stack(b_cols, axis=1)


# ---------------------------------------------------------------------------
# Fused Pallas kernel (whole forward pass, one dot per conv stage)
# ---------------------------------------------------------------------------
def _make_fused_kernel(n_conv, cp, out_c, n_batch, m_outs):
    """Refs: a0 (cp, M0), res (cp, sum m_outs), w_pack (depth, cp, 16*cp),
    b_pack (cp, depth), out (out_c, n_batch)."""

    def kernel(a0_ref, res_ref, w_ref, b_ref, o_ref):
        a = a0_ref[...]                                         # (cp, M0)
        off = 0
        # ---- depth-1 stages: 2x2 stride-2 conv -> ReLU -> + residual --------
        for j in range(n_conv):
            m = m_outs[j]                                       # N * H_out * W_out
            # 4 tap slices are contiguous lane ranges; stack along sublanes
            # (8-aligned pieces) -> single MXU dot with K = 4*cp.
            a_stack = jnp.concatenate(
                [a[:, q * m:(q + 1) * m] for q in range(4)], axis=0)       # (4cp, m)
            w_j = w_ref[j][:, :4 * cp]                                     # (cp, 4cp)
            y = jnp.dot(w_j, a_stack, preferred_element_type=jnp.float32)
            y = jnp.maximum(y + b_ref[:, j:j + 1], 0.0)
            a = y + res_ref[:, off:off + m]
            off += m

        # ---- final 4x4 valid conv (full spatial contraction) -> ReLU --------
        # 16 spatial slices stacked along sublanes -> ONE dot with K = 16*cp.
        a_stack = jnp.concatenate(
            [a[:, s * n_batch:(s + 1) * n_batch] for s in range(16)], axis=0)  # (16cp, N)
        y = jnp.dot(w_ref[n_conv], a_stack, preferred_element_type=jnp.float32)
        y = jnp.maximum(y + b_ref[:, n_conv:n_conv + 1], 0.0)
        o_ref[...] = y[:out_c, :].astype(o_ref.dtype)

    return kernel


# ---------------------------------------------------------------------------
# Forward pass wrapper (one grid-less pallas_call, layout plumbing around it)
# ---------------------------------------------------------------------------
def conv_hourglass_forward(xs, w_pack, b_pack, *, cp):
    """xs: list of `depth` NCHW pyramid tensors (spatial halves each level; the
    last level is 4x4).  w_pack/b_pack: from pack_params().  Returns (N, C)."""
    depth = len(xs)
    n_conv = depth - 1
    N, C, H0, W0 = xs[0].shape

    # Static layout assumptions -> fail loudly instead of producing wrong columns.
    assert depth >= 2 and H0 % (1 << n_conv) == 0 and W0 % (1 << n_conv) == 0
    assert xs[-1].shape[2:] == (4, 4)
    for j in range(n_conv):
        assert xs[j + 1].shape == (N, C, xs[j].shape[2] // 2, xs[j].shape[3] // 2)
    assert w_pack.shape == (depth, cp, 16 * cp) and b_pack.shape == (cp, depth)

    pad_c = ((0, cp - C), (0, 0))
    a0 = jnp.pad(_space_to_depth_channel_major(xs[0], n_conv), pad_c)
    res = jnp.concatenate(
        [jnp.pad(_space_to_depth_channel_major(xs[j + 1], n_conv - 1 - j), pad_c)
         for j in range(n_conv)], axis=1)
    m_outs = tuple(N * xs[j + 1].shape[2] * xs[j + 1].shape[3] for j in range(n_conv))

    flops = 2 * cp * (sum(4 * cp * m for m in m_outs) + 16 * cp * N)
    bytes_accessed = 4 * (a0.size + res.size + w_pack.size + b_pack.size + N * C)

    vmem = pl.BlockSpec(memory_space=pltpu.MemorySpace.VMEM)
    out_t = pl.pallas_call(
        _make_fused_kernel(n_conv, cp, C, N, m_outs),
        out_shape=jax.ShapeDtypeStruct((C, N), jnp.float32),
        in_specs=[vmem, vmem, vmem, vmem],
        out_specs=vmem,
        cost_estimate=pl.CostEstimate(flops=int(flops), transcendentals=0,
                                      bytes_accessed=int(bytes_accessed)),
    )(a0, res, w_pack, b_pack)
    # TODO(synk): for scaled-up production shapes add a batch-parallel grid axis
    # (second TensorCore on v7x) and lane-block the activations via BlockSpec.
    return out_t.T                                              # (batch, hg_feat)


# ---------------------------------------------------------------------------
# Pure-JAX reference (mirrors the PyTorch forward exactly)
# ---------------------------------------------------------------------------
def reference_forward(xs, params):
    x_ = xs[0]
    for i in range(len(xs) - 1):
        w, b = params[i]
        y = jax.lax.conv_general_dilated(
            x_, w, window_strides=(2, 2), padding='VALID',
            dimension_numbers=('NCHW', 'OIHW', 'NCHW'))
        y = jnp.maximum(y + b.reshape(1, -1, 1, 1), 0.0)
        x_ = xs[i + 1] + y
    w, b = params[-1]
    y = jax.lax.conv_general_dilated(
        x_, w, window_strides=(1, 1), padding='VALID',
        dimension_numbers=('NCHW', 'OIHW', 'NCHW'))
    y = jnp.squeeze(y + b.reshape(1, -1, 1, 1))
    return jnp.maximum(y, 0.0)


# ---------------------------------------------------------------------------
# Main
# ---------------------------------------------------------------------------
if __name__ == "__main__":
    depth = 3
    hg_feat = 4
    batch = 2
    base_hw = 16  # x[0] is 16x16; halved each stage so the last stage sees 4x4

    key = jax.random.PRNGKey(0)
    keys = jax.random.split(key, 3 * depth)

    # deterministic synthetic parameters (PyTorch Conv2d shapes: OIHW + bias)
    params = []
    for i in range(depth - 1):
        w = jax.random.normal(keys[2 * i], (hg_feat, hg_feat, 2, 2), jnp.float32) * 0.1
        b = jax.random.normal(keys[2 * i + 1], (hg_feat,), jnp.float32) * 0.1
        params.append((w, b))
    w_last = jax.random.normal(keys[2 * (depth - 1)], (hg_feat, hg_feat, 4, 4),
                               jnp.float32) * 0.1
    b_last = jax.random.normal(keys[2 * (depth - 1) + 1], (hg_feat,), jnp.float32) * 0.1
    params.append((w_last, b_last))

    # deterministic synthetic hourglass pyramid inputs (NCHW)
    xs = []
    for i in range(depth):
        hw = base_hw // (2 ** i)
        xs.append(jax.random.normal(keys[2 * depth + i],
                                    (batch, hg_feat, hw, hw), jnp.float32))

    # one-time parameter packing, hoisted out of the per-call jitted forward
    cp = max(8, _round_up(hg_feat, 8))
    w_pack, b_pack = jax.block_until_ready(pack_params(params, hg_feat, cp))

    fwd = jax.jit(functools.partial(conv_hourglass_forward, cp=cp))
    out = jax.block_until_ready(fwd(xs, w_pack, b_pack))

    ref = jax.block_until_ready(reference_forward(xs, params))
    assert out.shape == ref.shape == (batch, hg_feat), (out.shape, ref.shape)
    assert jnp.allclose(out, ref, atol=1e-4, rtol=1e-4), \
        f"max abs err {jnp.max(jnp.abs(out - ref))}"

    print("KERNEL_OK")
</pallas_src>

<mosaic_0001>
module attributes {stable_mosaic.version = 11 : i64} {
  func.func @kernel(%arg0: memref<8x512xf32, #tpu.memory_space<vmem>>, %arg1: memref<8x160xf32, #tpu.memory_space<vmem>>, %arg2: memref<3x8x128xf32, #tpu.memory_space<vmem>>, %arg3: memref<8x3xf32, #tpu.memory_space<vmem>>, %arg4: memref<4x2xf32, #tpu.memory_space<vmem>>) attributes {dimension_semantics = [], scalar_prefetch = 0 : i64, scratch_operands = 0 : i64, tpu.core_type = #tpu.core_type<tc>} {
    %c0 = arith.constant 0 : index
    %c0_0 = arith.constant 0 : index
    %0 = vector.load %arg0[%c0, %c0_0] : memref<8x512xf32, #tpu.memory_space<vmem>>, vector<8x512xf32>
    %1 = vector.extract_strided_slice %0 {offsets = [0, 0], sizes = [8, 128], strides = [1, 1]} : vector<8x512xf32> to vector<8x128xf32>
    %2 = vector.extract_strided_slice %0 {offsets = [0, 128], sizes = [8, 128], strides = [1, 1]} : vector<8x512xf32> to vector<8x128xf32>
    %3 = vector.extract_strided_slice %0 {offsets = [0, 256], sizes = [8, 128], strides = [1, 1]} : vector<8x512xf32> to vector<8x128xf32>
    %4 = vector.extract_strided_slice %0 {offsets = [0, 384], sizes = [8, 128], strides = [1, 1]} : vector<8x512xf32> to vector<8x128xf32>
    %5 = tpu.concatenate %1, %2, %3, %4 in 0 : vector<8x128xf32>, vector<8x128xf32>, vector<8x128xf32>, vector<8x128xf32> -> vector<32x128xf32>
    %c0_1 = arith.constant 0 : index
    %c0_2 = arith.constant 0 : index
    %c0_3 = arith.constant 0 : index
    %6 = vector.load %arg2[%c0_1, %c0_2, %c0_3] : memref<3x8x128xf32, #tpu.memory_space<vmem>>, vector<1x8x128xf32>
    %7 = vector.shape_cast %6 : vector<1x8x128xf32> to vector<8x128xf32>
    %8 = vector.extract_strided_slice %7 {offsets = [0, 0], sizes = [8, 32], strides = [1, 1]} : vector<8x128xf32> to vector<8x32xf32>
    %cst = arith.constant dense<0.000000e+00> : vector<8x128xf32>
    %9 = tpu.matmul %8, %5, %cst {dimension_numbers = #tpu.dot_dimension_numbers<[1], [0], [0], [1], [0, 0, 1, 1], [], []>} : vector<8x32xf32>, vector<32x128xf32>, vector<8x128xf32> -> vector<8x128xf32>
    %c0_4 = arith.constant 0 : index
    %c0_5 = arith.constant 0 : index
    %10 = vector.load %arg3[%c0_4, %c0_5] : memref<8x3xf32, #tpu.memory_space<vmem>>, vector<8x1xf32>
    %11 = vector.broadcast %10 : vector<8x1xf32> to vector<8x128xf32>
    %12 = arith.addf %9, %11 : vector<8x128xf32>
    %cst_6 = arith.constant 0.000000e+00 : f32
    %13 = vector.broadcast %cst_6 : f32 to vector<8x128xf32>
    %14 = arith.maximumf %12, %13 : vector<8x128xf32>
    %c0_7 = arith.constant 0 : index
    %c0_8 = arith.constant 0 : index
    %15 = vector.load %arg1[%c0_7, %c0_8] : memref<8x160xf32, #tpu.memory_space<vmem>>, vector<8x128xf32>
    %16 = arith.addf %14, %15 : vector<8x128xf32>
    %17 = vector.extract_strided_slice %16 {offsets = [0, 0], sizes = [8, 32], strides = [1, 1]} : vector<8x128xf32> to vector<8x32xf32>
    %18 = vector.extract_strided_slice %16 {offsets = [0, 32], sizes = [8, 32], strides = [1, 1]} : vector<8x128xf32> to vector<8x32xf32>
    %19 = vector.extract_strided_slice %16 {offsets = [0, 64], sizes = [8, 32], strides = [1, 1]} : vector<8x128xf32> to vector<8x32xf32>
    %20 = vector.extract_strided_slice %16 {offsets = [0, 96], sizes = [8, 32], strides = [1, 1]} : vector<8x128xf32> to vector<8x32xf32>
    %21 = tpu.concatenate %17, %18, %19, %20 in 0 : vector<8x32xf32>, vector<8x32xf32>, vector<8x32xf32>, vector<8x32xf32> -> vector<32x32xf32>
    %c1 = arith.constant 1 : index
    %c0_9 = arith.constant 0 : index
    %c0_10 = arith.constant 0 : index
    %22 = vector.load %arg2[%c1, %c0_9, %c0_10] : memref<3x8x128xf32, #tpu.memory_space<vmem>>, vector<1x8x128xf32>
    %23 = vector.shape_cast %22 : vector<1x8x128xf32> to vector<8x128xf32>
    %24 = vector.extract_strided_slice %23 {offsets = [0, 0], sizes = [8, 32], strides = [1, 1]} : vector<8x128xf32> to vector<8x32xf32>
    %cst_11 = arith.constant dense<0.000000e+00> : vector<8x32xf32>
    %25 = tpu.matmul %24, %21, %cst_11 {dimension_numbers = #tpu.dot_dimension_numbers<[1], [0], [0], [1], [0, 0, 1, 1], [], []>} : vector<8x32xf32>, vector<32x32xf32>, vector<8x32xf32> -> vector<8x32xf32>
    %c0_12 = arith.constant 0 : index
    %c1_13 = arith.constant 1 : index
    %26 = vector.load %arg3[%c0_12, %c1_13] : memref<8x3xf32, #tpu.memory_space<vmem>>, vector<8x1xf32>
    %27 = vector.broadcast %26 : vector<8x1xf32> to vector<8x32xf32>
    %28 = arith.addf %25, %27 : vector<8x32xf32>
    %cst_14 = arith.constant 0.000000e+00 : f32
    %29 = vector.broadcast %cst_14 : f32 to vector<8x32xf32>
    %30 = arith.maximumf %28, %29 : vector<8x32xf32>
    %c0_15 = arith.constant 0 : index
    %c128 = arith.constant 128 : index
    %31 = vector.load %arg1[%c0_15, %c128] : memref<8x160xf32, #tpu.memory_space<vmem>>, vector<8x32xf32>
    %32 = arith.addf %30, %31 : vector<8x32xf32>
    %33 = vector.extract_strided_slice %32 {offsets = [0, 0], sizes = [8, 2], strides = [1, 1]} : vector<8x32xf32> to vector<8x2xf32>
    %34 = vector.extract_strided_slice %32 {offsets = [0, 2], sizes = [8, 2], strides = [1, 1]} : vector<8x32xf32> to vector<8x2xf32>
    %35 = vector.extract_strided_slice %32 {offsets = [0, 4], sizes = [8, 2], strides = [1, 1]} : vector<8x32xf32> to vector<8x2xf32>
    %36 = vector.extract_strided_slice %32 {offsets = [0, 6], sizes = [8, 2], strides = [1, 1]} : vector<8x32xf32> to vector<8x2xf32>
    %37 = vector.extract_strided_slice %32 {offsets = [0, 8], sizes = [8, 2], strides = [1, 1]} : vector<8x32xf32> to vector<8x2xf32>
    %38 = vector.extract_strided_slice %32 {offsets = [0, 10], sizes = [8, 2], strides = [1, 1]} : vector<8x32xf32> to vector<8x2xf32>
    %39 = vector.extract_strided_slice %32 {offsets = [0, 12], sizes = [8, 2], strides = [1, 1]} : vector<8x32xf32> to vector<8x2xf32>
    %40 = vector.extract_strided_slice %32 {offsets = [0, 14], sizes = [8, 2], strides = [1, 1]} : vector<8x32xf32> to vector<8x2xf32>
    %41 = vector.extract_strided_slice %32 {offsets = [0, 16], sizes = [8, 2], strides = [1, 1]} : vector<8x32xf32> to vector<8x2xf32>
    %42 = vector.extract_strided_slice %32 {offsets = [0, 18], sizes = [8, 2], strides = [1, 1]} : vector<8x32xf32> to vector<8x2xf32>
    %43 = vector.extract_strided_slice %32 {offsets = [0, 20], sizes = [8, 2], strides = [1, 1]} : vector<8x32xf32> to vector<8x2xf32>
    %44 = vector.extract_strided_slice %32 {offsets = [0, 22], sizes = [8, 2], strides = [1, 1]} : vector<8x32xf32> to vector<8x2xf32>
    %45 = vector.extract_strided_slice %32 {offsets = [0, 24], sizes = [8, 2], strides = [1, 1]} : vector<8x32xf32> to vector<8x2xf32>
    %46 = vector.extract_strided_slice %32 {offsets = [0, 26], sizes = [8, 2], strides = [1, 1]} : vector<8x32xf32> to vector<8x2xf32>
    %47 = vector.extract_strided_slice %32 {offsets = [0, 28], sizes = [8, 2], strides = [1, 1]} : vector<8x32xf32> to vector<8x2xf32>
    %48 = vector.extract_strided_slice %32 {offsets = [0, 30], sizes = [8, 2], strides = [1, 1]} : vector<8x32xf32> to vector<8x2xf32>
    %49 = tpu.concatenate %33, %34, %35, %36, %37, %38, %39, %40, %41, %42, %43, %44, %45, %46, %47, %48 in 0 : vector<8x2xf32>, vector<8x2xf32>, vector<8x2xf32>, vector<8x2xf32>, vector<8x2xf32>, vector<8x2xf32>, vector<8x2xf32>, vector<8x2xf32>, vector<8x2xf32>, vector<8x2xf32>, vector<8x2xf32>, vector<8x2xf32>, vector<8x2xf32>, vector<8x2xf32>, vector<8x2xf32>, vector<8x2xf32> -> vector<128x2xf32>
    %c2 = arith.constant 2 : index
    %c0_16 = arith.constant 0 : index
    %c0_17 = arith.constant 0 : index
    %50 = vector.load %arg2[%c2, %c0_16, %c0_17] : memref<3x8x128xf32, #tpu.memory_space<vmem>>, vector<1x8x128xf32>
    %51 = vector.shape_cast %50 : vector<1x8x128xf32> to vector<8x128xf32>
    %cst_18 = arith.constant dense<0.000000e+00> : vector<8x2xf32>
    %52 = tpu.matmul %51, %49, %cst_18 {dimension_numbers = #tpu.dot_dimension_numbers<[1], [0], [0], [1], [0, 0, 1, 1], [], []>} : vector<8x128xf32>, vector<128x2xf32>, vector<8x2xf32> -> vector<8x2xf32>
    %c0_19 = arith.constant 0 : index
    %c2_20 = arith.constant 2 : index
    %53 = vector.load %arg3[%c0_19, %c2_20] : memref<8x3xf32, #tpu.memory_space<vmem>>, vector<8x1xf32>
    %54 = vector.broadcast %53 : vector<8x1xf32> to vector<8x2xf32>
    %55 = arith.addf %52, %54 : vector<8x2xf32>
    %cst_21 = arith.constant 0.000000e+00 : f32
    %56 = vector.broadcast %cst_21 : f32 to vector<8x2xf32>
    %57 = arith.maximumf %55, %56 : vector<8x2xf32>
    %58 = vector.extract_strided_slice %57 {offsets = [0, 0], sizes = [4, 2], strides = [1, 1]} : vector<8x2xf32> to vector<4x2xf32>
    %c0_22 = arith.constant 0 : index
    %c0_23 = arith.constant 0 : index
    %59 = vector.load %arg4[%c0_22, %c0_23] : memref<4x2xf32, #tpu.memory_space<vmem>>, vector<4x2xf32>
    tpu.vector_store %arg4[%c0_22, %c0_23], %58 {strides = array<i32>} : memref<4x2xf32, #tpu.memory_space<vmem>>, vector<4x2xf32>,
    return
  }
}

</mosaic_0001>

<bundles_post_ra>
// kernel: conv_hourglass_forward.1
= control target key start
LH: loop header
LB: loop body
LE: loop exit
PB: predicated region body
PF: predicated region fallthrough
CT: control target
= control target key end

     0   :  { %v478_v0 = vmov 0.0|0.0   ;;  %vm479_vm0 = vmmov 0   ;;  %v480_v4 = vmov 0.0   ;;  %v481_v7 = vmov 0   ;;  %s483_s27 = smov 64   ;;  %s484_s28 = smov 96   ;;  %s582_s0 = inlined_call_operand.vmem [shape: f32[8,512], index: 0, kind: input, shape index: {}]   ;;  %s583_s3 = inlined_call_operand.vmem [shape: f32[8,3], index: 3, kind: input, shape index: {}]   ;;  %s584_s2 = inlined_call_operand.vmem [shape: f32[3,8,128], index: 2, kind: input, shape index: {}]   ;;  %s585_s1 = inlined_call_operand.vmem [shape: f32[8,160], index: 1, kind: input, shape index: {}]   ;;  %s586_s4 = inlined_call_operand.vmem [shape: f32[4,2], index: 4, kind: output, shape index: {}]  }
   0x1   :  { %414 = vmatprep.subr.bf16.mxu1 %v478_v0  ;;  %v17_v1 = vld [vmem:[%s582_s0] sm:$0xff]  ;;  %v18_v2 = vld [vmem:[%s582_s0 + $0x8] sm:$0xff]  ;;  %v19_v3 = vld [vmem:[%s582_s0 + $0x10] sm:$0xff]  ;;  %365 = vmatprep.mubr.msk.f32.mxu1 %vm479_vm0, %v480_v4  ;;  %vm28_vm1 = vcmask 261120   ;;  %v482_v17 = vmov 1   ;;  %s485_s29 = smov 32  }
   0x2   :  { %v415_v5 = vpack.c.bf16 %v18_v2, %v17_v1  ;;  %v20_v6 = vld [vmem:[%s582_s0 + $0x18] sm:$0xff]  ;;  %474 = vset.pattern.permute.xlu0 %v481_v7  ;;  %v544_v8 = vld [vmem:[%s583_s3] sm:$0xff]  ;;  %426 = vmatprep.subr.bf16.mxu0 %v478_v0  ;;  %v327_v24 = vld [vmem:[%s584_s2 + $0x8] sm:$0xff]  ;;  %s486_s8 = smov 122   ;;  %s487_s9 = smov 126   ;;  %v498_v32 = vmov 2  }
   0x3   :  { %25 = vperm.xlu0 %474, %v544_v8   ;;  %411 = vmatprep.mubr.msk.f32.mxu0 %vm479_vm0, %v480_v4  ;;  %v418_v9 = vpack.c.bf16 %v20_v6, %v19_v3  ;;  %v21_v10 = vld [vmem:[%s584_s2] sm:$0xff]  ;;  %v195_v29 = vld [vmem:[%s585_s1 + $0x8] sm:$0xff]  ;;  %s488_s10 = smov 118   ;;  %s489_s11 = smov 124   ;;  %v329_v56 = vld [vmem:[%s584_s2 + $0x10] sm:$0xff]  ;;  %vm320_vm2 = vcmask 11264  }
   0x4   :  { %416 = vmatpush3.bf16.msra.mxu1 %v415_v5  ;;  %v103_v15 = vld [vmem:[%s585_s1] sm:$0xff]  ;;  %s490_s12 = smov 114   ;;  %s491_s13 = smov 120   ;;  %476 = vset.pattern.permute.xlu1 %v498_v32 }
   0x5   :  { %417 = vmatprep.subr.bf16.mxu1 %v478_v0  ;;  %s492_s14 = smov 110   ;;  %s493_s15 = smov 116  }
   0x6   :  { %s494_s16 = smov 106   ;;  %s495_s1 = smov 112  }
   0x7   :  { %475 = vset.pattern.permute.xlu0 %v482_v17  ;;  %s496_s17 = smov 102   ;;  %s497_s18 = smov 108  }
   0x8   :  { %419 = vmatpush3.bf16.msra.mxu1 %v418_v9  ;;  %s499_s19 = smov 98   ;;  %s500_s20 = smov 104  }
   0x9   :  { %420 = vmatprep.subr.bf16.mxu1 %v478_v0  ;;  %s501_s21 = smov 100  }
   0xb   :  { %366 = vmatmul.mubr.msk.f32.vlgmr.msra.gmra.mrb[0].mxu1 %vm28_vm1, %v21_v10 }
   0xc   :  { %376 = vmatprep.mubr.msk.f32.mxu1 %vm479_vm0, %v480_v4 }
  0x82   :  { %v26_v11 = vpop.permute.xlu0 %25 }
  0xde   :  { %v98_v12 = vpop.f32.mrb[0].mxu1 }
  0xdf   :  { %v99_v13 = vadd.f32 %v98_v12, %v26_v11  ;;  %v367_v14 = vpop.f32.mrb[1].mxu1 }
  0xe1   :  { %v102_v16 = vmax.f32 %v99_v13, 0.0 }
  0xe3   :  { %v104_v18 = vadd.f32 %v103_v15, %v102_v16 }
  0xe5   :  { %109 = vrot.lane.b32.xlu1 %v104_v18, %s483_s27  ;;  %106 = vrot.lane.b32.xlu0 %v104_v18, %s484_s28 }
  0xe9   :  { %112 = vrot.lane.b32.xlu1 %v104_v18, %s485_s29  ;;  %118 = vperm.xlu0 %475, %v544_v8  }
  0xed   :  { %477 = vset.pattern.permute.xlu0 %v498_v32 }
 0x157   :  { %v110_v19 = vpop.permute.xlu1 %109  ;;  %v107_v20 = vpop.permute.xlu0 %106 }
 0x158   :  { %v421_v21 = vpack.c.bf16 %v107_v20, %v104_v18 }
 0x15a   :  { %422 = vmatpush3.bf16.msra.mxu1 %v421_v21 }
 0x15b   :  { %v113_v22 = vpop.permute.xlu1 %112  ;;  %423 = vmatprep.subr.bf16.mxu1 %v478_v0 }
 0x15c   :  { %v424_v23 = vpack.c.bf16 %v113_v22, %v110_v19 }
 0x15e   :  { %425 = vmatpush3.bf16.msra.mxu1 %v424_v23 }
 0x161   :  { %377 = vmatmul.mubr.msk.f32.vlgmr.msra.gmra.mrb[2].mxu1 %vm28_vm1, %v327_v24 }
 0x168   :  { %v119_v25 = vpop.permute.xlu0 %118 }
 0x234   :  { %v190_v26 = vpop.f32.mrb[2].mxu1 }
 0x235   :  { %v191_v27 = vadd.f32 %v190_v26, %v119_v25  ;;  %v378_v28 = vpop.f32.mrb[3].mxu1 }
 0x237   :  { %v194_v30 = vmax.f32 %v191_v27, 0.0 }
 0x239   :  { %v196_v31 = vadd.f32 %v195_v29, %v194_v30 }
 0x23b   :  { %204 = vrot.lane.b32.xlu0 %v196_v31, %s486_s8  ;;  %198 = vrot.lane.b32.xlu1 %v196_v31, %s487_s9 }
 0x23f   :  { %210 = vrot.lane.b32.xlu0 %v196_v31, %s488_s10  ;;  %201 = vrot.lane.b32.xlu1 %v196_v31, %s489_s11 }
 0x243   :  { %216 = vrot.lane.b32.xlu0 %v196_v31, %s490_s12  ;;  %207 = vrot.lane.b32.xlu1 %v196_v31, %s491_s13 }
 0x247   :  { %222 = vrot.lane.b32.xlu0 %v196_v31, %s492_s14  ;;  %213 = vrot.lane.b32.xlu1 %v196_v31, %s493_s15 }
 0x24b   :  { %228 = vrot.lane.b32.xlu0 %v196_v31, %s494_s16  ;;  %219 = vrot.lane.b32.xlu1 %v196_v31, %s495_s1 }
 0x24f   :  { %234 = vrot.lane.b32.xlu0 %v196_v31, %s496_s17  ;;  %225 = vrot.lane.b32.xlu1 %v196_v31, %s497_s18 }
 0x253   :  { %240 = vrot.lane.b32.xlu0 %v196_v31, %s499_s19  ;;  %231 = vrot.lane.b32.xlu1 %v196_v31, %s500_s20 }
 0x257   :  { %237 = vrot.lane.b32.xlu1 %v196_v31, %s501_s21 }
 0x25b   :  { %246 = vperm.xlu1 %476, %v544_v8  }
 0x2ad   :  { %v205_v33 = vpop.permute.xlu0 %204  ;;  %v199_v34 = vpop.permute.xlu1 %198 }
 0x2ae   :  { %v427_v35 = vpack.c.bf16 %v199_v34, %v196_v31 }
 0x2b0   :  { %428 = vmatpush3.bf16.msra.mxu0 %v427_v35 }
 0x2b1   :  { %v211_v36 = vpop.permute.xlu0 %210  ;;  %v202_v37 = vpop.permute.xlu1 %201  ;;  %429 = vmatprep.subr.bf16.mxu0 %v478_v0 }
 0x2b2   :  { %v430_v38 = vpack.c.bf16 %v205_v33, %v202_v37 }
 0x2b4   :  { %431 = vmatpush3.bf16.msra.mxu0 %v430_v38 }
 0x2b5   :  { %v217_v39 = vpop.permute.xlu0 %216  ;;  %v208_v40 = vpop.permute.xlu1 %207  ;;  %432 = vmatprep.subr.bf16.mxu0 %v478_v0 }
 0x2b6   :  { %v433_v41 = vpack.c.bf16 %v211_v36, %v208_v40 }
 0x2b8   :  { %434 = vmatpush3.bf16.msra.mxu0 %v433_v41 }
 0x2b9   :  { %v223_v42 = vpop.permute.xlu0 %222  ;;  %v214_v43 = vpop.permute.xlu1 %213  ;;  %435 = vmatprep.subr.bf16.mxu0 %v478_v0 }
 0x2ba   :  { %v436_v44 = vpack.c.bf16 %v217_v39, %v214_v43 }
 0x2bc   :  { %437 = vmatpush3.bf16.msra.mxu0 %v436_v44 }
 0x2bd   :  { %v229_v45 = vpop.permute.xlu0 %228  ;;  %v220_v46 = vpop.permute.xlu1 %219  ;;  %438 = vmatprep.subr.bf16.mxu0 %v478_v0 }
 0x2be   :  { %v439_v47 = vpack.c.bf16 %v223_v42, %v220_v46 }
 0x2c0   :  { %440 = vmatpush3.bf16.msra.mxu0 %v439_v47 }
 0x2c1   :  { %v226_v48 = vpop.permute.xlu1 %225  ;;  %441 = vmatprep.subr.bf16.mxu0 %v478_v0  ;;  %v235_v50 = vpop.permute.xlu0 %234 }
 0x2c2   :  { %v442_v49 = vpack.c.bf16 %v229_v45, %v226_v48 }
 0x2c4   :  { %443 = vmatpush3.bf16.msra.mxu0 %v442_v49 }
 0x2c5   :  { %v232_v51 = vpop.permute.xlu1 %231  ;;  %444 = vmatprep.subr.bf16.mxu0 %v478_v0  ;;  %v241_v53 = vpop.permute.xlu0 %240 }
 0x2c6   :  { %v445_v52 = vpack.c.bf16 %v235_v50, %v232_v51 }
 0x2c8   :  { %446 = vmatpush3.bf16.msra.mxu0 %v445_v52 }
 0x2c9   :  { %v238_v54 = vpop.permute.xlu1 %237  ;;  %447 = vmatprep.subr.bf16.mxu0 %v478_v0 }
 0x2ca   :  { %v448_v55 = vpack.c.bf16 %v241_v53, %v238_v54 }
 0x2cc   :  { %449 = vmatpush3.bf16.msra.mxu0 %v448_v55 }
 0x2cf   :  { %412 = vmatmul.mubr.f32.vlgmr.msra.gmra.mrb[0].mxu0 %v329_v56 }
 0x2da   :  { %v247_v57 = vpop.permute.xlu1 %246 }
 0x3a2   :  { %v315_v58 = vpop.f32.mrb[0].mxu0 }
 0x3a3   :  { %v316_v59 = vadd.f32 %v315_v58, %v247_v57  ;;  %v413_v60 = vpop.f32.mrb[1].mxu0 }
 0x3a5   :  { %v319_v61 = vmax.f32 %v316_v59, 0.0 }
 0x3a7   :  { %321 = vst.msk [vmem:[%s586_s4] sm:$0xf] %vm320_vm2, %v319_v61 }

</bundles_post_ra>
